<compile_context>
chip_gen: v6e
topology: v6e:2x2x1
jax: 0.10.0
libtpu: 0.0.40
codegen_flags: <defaults>
</compile_context>

<pallas_src>
import functools

import jax
import jax.numpy as jnp
from jax.experimental import pallas as pl
from jax.experimental.pallas import tpu as pltpu


def _round_up(x, m):
    return ((x + m - 1) // m) * m


def _rpe_kernel(coord_ref, table_ref, out_ref, onehot_ref, *, rpe_pad):
    # coord_ref : (1, TILE) int32 -- three packed 8-bit shifted indices per point
    # table_ref : (H, 3*rpe_pad) f32 -- per-axis table, zero-padded to rpe_pad
    # out_ref   : (H, TILE) f32
    # onehot_ref: (3*rpe_pad, TILE) f32 VMEM scratch
    packed = coord_ref[...]                                           # (1, TILE)
    tile = out_ref.shape[-1]
    r_iota = jax.lax.broadcasted_iota(jnp.int32, (rpe_pad, tile), 0)
    for d in range(3):                                                # static 3x unroll
        idx_d = jnp.bitwise_and(jnp.right_shift(packed, 8 * d), 0xFF)  # (1, TILE)
        onehot_ref[d * rpe_pad:(d + 1) * rpe_pad, :] = (idx_d == r_iota).astype(jnp.float32)
    # gather + sum over all 3 coordinate axes == one skinny MXU matmul.
    out_ref[...] = jnp.dot(table_ref[...], onehot_ref[...],
                           preferred_element_type=jnp.float32)        # (H, TILE)


def rpe_forward(coord, rpe_table, patch_size, num_heads, *, lane_tile=16384):
    """coord: (B, K, K, 3) int; rpe_table: (3*rpe_num, H) f32.
    Returns (B, num_heads, K, K) f32, matching the PyTorch module."""
    pos_bnd = int((4 * patch_size) ** (1 / 3) * 2)
    rpe_num = 2 * pos_bnd + 1
    assert rpe_num <= 256, "8-bit index packing requires rpe_num <= 256"
    rpe_pad = _round_up(rpe_num, 8)          # sublane-aligned per-axis block

    B, K1, K2, C = coord.shape
    assert C == 3
    KK = K1 * K2

    # ---- lane-tile selection ------------------------------------------------
    kk128 = _round_up(KK, 128)
    tile = min(_round_up(lane_tile, 128), kk128)

    def _vmem_bytes(t):  # one-hot scratch + double-buffered out + packed-coord blocks
        return 4 * t * (3 * rpe_pad + 2 * num_heads + 2)

    while tile > 128 and _vmem_bytes(tile) > 20 * 1024 * 1024:
        tile = max(128, _round_up(tile // 2, 128))
    # v7x megacore: give the parallel grid >= 2 steps even when B == 1.
    if B == 1 and kk128 > 128:
        tile = min(tile, _round_up(kk128 // 2, 128))
    kk_pad = _round_up(KK, tile)

    # ---- clamp + shift + pack (single fused XLA pre-pass) --------------------
    idx = jnp.clip(coord.astype(jnp.int32), -pos_bnd, pos_bnd) + pos_bnd      # (B,K,K,3)
    packed = (idx[..., 0] | (idx[..., 1] << 8) | (idx[..., 2] << 16)).reshape(B, 1, KK)
    if kk_pad != KK:
        packed = jnp.pad(packed, ((0, 0), (0, 0), (0, kk_pad - KK)))          # zero lanes = valid idx 0, sliced off

    # Table -> single (H, 3*rpe_pad) MXU LHS, zero-padded per axis.
    t = rpe_table.astype(jnp.float32).reshape(3, rpe_num, num_heads)
    t = jnp.pad(t, ((0, 0), (0, rpe_pad - rpe_num), (0, 0)))
    table_lhs = jnp.transpose(t, (2, 0, 1)).reshape(num_heads, 3 * rpe_pad)

    kernel = functools.partial(_rpe_kernel, rpe_pad=rpe_pad)
    out = pl.pallas_call(
        kernel,
        out_shape=jax.ShapeDtypeStruct((B, num_heads, kk_pad), jnp.float32),
        grid_spec=pltpu.PrefetchScalarGridSpec(
            num_scalar_prefetch=0,
            grid=(B, kk_pad // tile),
            in_specs=[
                pl.BlockSpec((None, 1, tile), lambda b, i: (b, 0, i)),
                pl.BlockSpec((num_heads, 3 * rpe_pad), lambda b, i: (0, 0)),
            ],
            out_specs=pl.BlockSpec((None, num_heads, tile), lambda b, i: (b, 0, i)),
            scratch_shapes=[pltpu.VMEM((3 * rpe_pad, tile), jnp.float32)],
        ),
        compiler_params=pltpu.CompilerParams(
            dimension_semantics=("parallel", "parallel")),
    )(packed, table_lhs)

    # Output already in (B, H, points) layout: free reshape (+ slice if padded).
    if kk_pad != KK:
        out = out[:, :, :KK]
    return out.reshape(B, num_heads, K1, K2)


def rpe_reference(coord, rpe_table, patch_size):
    """Pure-JAX reference mirroring the PyTorch forward exactly."""
    pos_bnd = int((4 * patch_size) ** (1 / 3) * 2)
    rpe_num = 2 * pos_bnd + 1
    idx = jnp.clip(coord, -pos_bnd, pos_bnd) + pos_bnd + jnp.arange(3) * rpe_num
    out = jnp.take(rpe_table, idx.reshape(-1), axis=0)
    out = out.reshape(idx.shape + (rpe_table.shape[-1],)).sum(3)
    return jnp.transpose(out, (0, 3, 1, 2))


if __name__ == "__main__":
    patch_size = 8
    num_heads = 4

    pos_bnd = int((4 * patch_size) ** (1 / 3) * 2)
    rpe_num = 2 * pos_bnd + 1

    key = jax.random.PRNGKey(0)
    k_coord, k_table, k_coord2, k_coord3 = jax.random.split(key, 4)

    # Deterministic stand-in for trunc_normal_(std=0.02).
    rpe_table = jax.random.normal(k_table, (3 * rpe_num, num_heads), jnp.float32) * 0.02

    # Case 1: B=2, K=8 -> KK=64 (lane-padding path, multi-batch grid).
    B, K = 2, 8
    coord = jax.random.randint(k_coord, (B, K, K, 3), -10, 11, dtype=jnp.int32)
    out = jax.block_until_ready(rpe_forward(coord, rpe_table, patch_size, num_heads))
    ref = rpe_reference(coord, rpe_table, patch_size)
    assert out.shape == (B, num_heads, K, K), out.shape
    assert jnp.allclose(out, ref, atol=1e-6, rtol=1e-6), float(jnp.abs(out - ref).max())

    # Case 2: B=1, ragged K=6 (padding + single-batch path).
    B2, Kr = 1, 6
    coord2 = jax.random.randint(k_coord2, (B2, Kr, Kr, 3), -10, 11, dtype=jnp.int32)
    out2 = jax.block_until_ready(rpe_forward(coord2, rpe_table, patch_size, num_heads))
    ref2 = rpe_reference(coord2, rpe_table, patch_size)
    assert out2.shape == (B2, num_heads, Kr, Kr), out2.shape
    assert jnp.allclose(out2, ref2, atol=1e-6, rtol=1e-6), float(jnp.abs(out2 - ref2).max())

    # Case 3: B=2, K=16 -> KK=256 (no-padding path, lane-dense stores).
    B3, K3 = 2, 16
    coord3 = jax.random.randint(k_coord3, (B3, K3, K3, 3), -10, 11, dtype=jnp.int32)
    out3 = jax.block_until_ready(rpe_forward(coord3, rpe_table, patch_size, num_heads))
    ref3 = rpe_reference(coord3, rpe_table, patch_size)
    assert out3.shape == (B3, num_heads, K3, K3), out3.shape
    assert jnp.allclose(out3, ref3, atol=1e-6, rtol=1e-6), float(jnp.abs(out3 - ref3).max())

    print("KERNEL_OK")
</pallas_src>

<mosaic_0001>
module attributes {stable_mosaic.version = 11 : i64} {
  func.func @_rpe_kernel(%arg0: i32, %arg1: i32, %arg2: memref<1x1x128xi32, #tpu.memory_space<vmem>>, %arg3: memref<4x48xf32, #tpu.memory_space<vmem>>, %arg4: memref<1x4x128xf32, #tpu.memory_space<vmem>>, %arg5: memref<48x128xf32, #tpu.memory_space<vmem>>) attributes {dimension_semantics = [#tpu.dimension_semantics<parallel>, #tpu.dimension_semantics<parallel>], iteration_bounds = array<i64: 2, 1>, scalar_prefetch = 0 : i64, scratch_operands = 1 : i64, tpu.core_type = #tpu.core_type<tc>, window_params = [{transform_indices = @transform_0, window_bounds = array<i64: 1, 1, 128>}, {pipeline_mode = #tpu.pipeline_mode<synchronous>, transform_indices = @transform_1, window_bounds = array<i64: 4, 48>}, {transform_indices = @transform_2, window_bounds = array<i64: 1, 4, 128>}]} {
    %c0 = arith.constant 0 : index
    %c0_0 = arith.constant 0 : index
    %c0_1 = arith.constant 0 : index
    %0 = vector.load %arg2[%c0, %c0_0, %c0_1] : memref<1x1x128xi32, #tpu.memory_space<vmem>>, vector<1x1x128xi32>
    %1 = vector.shape_cast %0 : vector<1x1x128xi32> to vector<1x128xi32>
    %2 = tpu.iota {dimensions = array<i32: 0>} : vector<16x128xi32>
    %c0_i32 = arith.constant 0 : i32
    %3 = vector.broadcast %c0_i32 : i32 to vector<1x128xi32>
    %4 = arith.shrsi %1, %3 : vector<1x128xi32>
    %c255_i32 = arith.constant 255 : i32
    %5 = vector.broadcast %c255_i32 : i32 to vector<1x128xi32>
    %6 = arith.andi %4, %5 : vector<1x128xi32>
    %7 = vector.broadcast %6 : vector<1x128xi32> to vector<16x128xi32>
    %8 = arith.cmpi eq, %7, %2 : vector<16x128xi32>
    %9 = arith.extui %8 : vector<16x128xi1> to vector<16x128xi32>
    %10 = arith.sitofp %9 : vector<16x128xi32> to vector<16x128xf32>
    %c0_2 = arith.constant 0 : index
    %c0_3 = arith.constant 0 : index
    %11 = vector.load %arg5[%c0_2, %c0_3] : memref<48x128xf32, #tpu.memory_space<vmem>>, vector<16x128xf32>
    tpu.vector_store %arg5[%c0_2, %c0_3], %10 {strides = array<i32>} : memref<48x128xf32, #tpu.memory_space<vmem>>, vector<16x128xf32>,
    %c8_i32 = arith.constant 8 : i32
    %12 = vector.broadcast %c8_i32 : i32 to vector<1x128xi32>
    %13 = arith.shrsi %1, %12 : vector<1x128xi32>
    %c255_i32_4 = arith.constant 255 : i32
    %14 = vector.broadcast %c255_i32_4 : i32 to vector<1x128xi32>
    %15 = arith.andi %13, %14 : vector<1x128xi32>
    %16 = vector.broadcast %15 : vector<1x128xi32> to vector<16x128xi32>
    %17 = arith.cmpi eq, %16, %2 : vector<16x128xi32>
    %18 = arith.extui %17 : vector<16x128xi1> to vector<16x128xi32>
    %19 = arith.sitofp %18 : vector<16x128xi32> to vector<16x128xf32>
    %c16 = arith.constant 16 : index
    %c0_5 = arith.constant 0 : index
    %20 = vector.load %arg5[%c16, %c0_5] : memref<48x128xf32, #tpu.memory_space<vmem>>, vector<16x128xf32>
    tpu.vector_store %arg5[%c16, %c0_5], %19 {strides = array<i32>} : memref<48x128xf32, #tpu.memory_space<vmem>>, vector<16x128xf32>,
    %c16_i32 = arith.constant 16 : i32
    %21 = vector.broadcast %c16_i32 : i32 to vector<1x128xi32>
    %22 = arith.shrsi %1, %21 : vector<1x128xi32>
    %c255_i32_6 = arith.constant 255 : i32
    %23 = vector.broadcast %c255_i32_6 : i32 to vector<1x128xi32>
    %24 = arith.andi %22, %23 : vector<1x128xi32>
    %25 = vector.broadcast %24 : vector<1x128xi32> to vector<16x128xi32>
    %26 = arith.cmpi eq, %25, %2 : vector<16x128xi32>
    %27 = arith.extui %26 : vector<16x128xi1> to vector<16x128xi32>
    %28 = arith.sitofp %27 : vector<16x128xi32> to vector<16x128xf32>
    %c32 = arith.constant 32 : index
    %c0_7 = arith.constant 0 : index
    %29 = vector.load %arg5[%c32, %c0_7] : memref<48x128xf32, #tpu.memory_space<vmem>>, vector<16x128xf32>
    tpu.vector_store %arg5[%c32, %c0_7], %28 {strides = array<i32>} : memref<48x128xf32, #tpu.memory_space<vmem>>, vector<16x128xf32>,
    %c0_8 = arith.constant 0 : index
    %c0_9 = arith.constant 0 : index
    %30 = vector.load %arg3[%c0_8, %c0_9] : memref<4x48xf32, #tpu.memory_space<vmem>>, vector<4x48xf32>
    %c0_10 = arith.constant 0 : index
    %c0_11 = arith.constant 0 : index
    %31 = vector.load %arg5[%c0_10, %c0_11] : memref<48x128xf32, #tpu.memory_space<vmem>>, vector<48x128xf32>
    %cst = arith.constant dense<0.000000e+00> : vector<4x128xf32>
    %32 = tpu.matmul %30, %31, %cst {dimension_numbers = #tpu.dot_dimension_numbers<[1], [0], [0], [1], [0, 0, 1, 1], [], []>} : vector<4x48xf32>, vector<48x128xf32>, vector<4x128xf32> -> vector<4x128xf32>
    %c0_12 = arith.constant 0 : index
    %c0_13 = arith.constant 0 : index
    %c0_14 = arith.constant 0 : index
    %33 = vector.load %arg4[%c0_12, %c0_13, %c0_14] : memref<1x4x128xf32, #tpu.memory_space<vmem>>, vector<1x4x128xf32>
    %34 = vector.shape_cast %33 : vector<1x4x128xf32> to vector<4x128xf32>
    %35 = vector.shape_cast %32 : vector<4x128xf32> to vector<1x4x128xf32>
    tpu.vector_store %arg4[%c0_12, %c0_13, %c0_14], %35 {strides = array<i32>} : memref<1x4x128xf32, #tpu.memory_space<vmem>>, vector<1x4x128xf32>,
    return
  }
  func.func @transform_0(%arg0: i32, %arg1: i32) -> (i32, i32, i32) {
    %c0_i32 = arith.constant 0 : i32
    %c0_i32_0 = arith.constant 0 : i32
    return %arg0, %c0_i32, %arg1 : i32, i32, i32
  }
  func.func @transform_1(%arg0: i32, %arg1: i32) -> (i32, i32) {
    %c0_i32 = arith.constant 0 : i32
    %c0_i32_0 = arith.constant 0 : i32
    %c0_i32_1 = arith.constant 0 : i32
    return %c0_i32, %c0_i32_0 : i32, i32
  }
  func.func @transform_2(%arg0: i32, %arg1: i32) -> (i32, i32, i32) {
    %c0_i32 = arith.constant 0 : i32
    %c0_i32_0 = arith.constant 0 : i32
    return %arg0, %c0_i32, %arg1 : i32, i32, i32
  }
}

</mosaic_0001>

<bundles_post_ra>
// kernel: tpu_custom_call.1
= control target key start
LH: loop header
LB: loop body
LE: loop exit
PB: predicated region body
PF: predicated region fallthrough
CT: control target
= control target key end

     0   :  { %7 = vsyncpa [#allocation4], 0  ;;  %s874_s0 = inlined_call_operand.hbm [shape: s32[2,1,128], index: 0, kind: input, shape index: {}]   ;;  %s875_s1 = inlined_call_operand.hbm [shape: f32[4,48], index: 1, kind: input, shape index: {}]   ;;  %s876_s2 = inlined_call_operand.hbm [shape: f32[2,4,128], index: 2, kind: output, shape index: {}]  }
   0x1   :  { %9 = vsyncpa [#allocation4 + $0x1], 0 }
   0x2   :  { %10 = vsyncpa [#allocation7], 0 }
   0x3   :  { %11 = vsyncpa [#allocation5], 0 }
   0x4   :  { %13 = vsyncpa [#allocation5 + $0x1], 0  ;;  %s700_s9 = smov 0   ;;  %s702_s10 = smov 0  }
   0x5   :  { %s704_s11 = smov 0   ;;  %s706_s12 = smov 0  }
   0x6   :  { %s708_s13 = smov 0   ;;  %s710_s14 = smov 0  }
   0x7 LB: > { %s415_s15 = sadd.s32 4294967295, %s677_s14   ;;  %s416_s16 = sadd.s32 4294967294, %s677_s14   ;;  %s677_s14 = sphi %s710_s14, %s19_s14   ;;  %s673_s13 = sphi %s708_s13, %s893_s13   ;;  %s669_s12 = sphi %s706_s12, %s892_s12   ;;  %s665_s11 = sphi %s704_s11, %s891_s11   ;;  %s661_s10 = sphi %s702_s10, %s890_s10   ;;  %s657_s9 = sphi %s700_s9, %s889_s9  }
   0x8   : > { %p53_p0 = scmp.ne.s32.totalorder %s661_s10, %s657_s9  ;;  %p734_p1 = scmp.eq.s32.totalorder %s415_s15, 0 }
   0x9   : > { %p738_p2 = scmp.eq.s32.totalorder %s415_s15, 1  ;;  %p106_p3 = scmp.eq.s32.totalorder %s416_s16, 1 }
   0xa   : > { %p744_p4 = por %p734_p1, %p53_p0  ;;  %p417_p5 = scmp.ge.s32.totalorder %s677_s14, 1 }
   0xb   : > { %p749_p6 = por %p106_p3, %p53_p0  ;;  %p113_p7 = scmp.lt.s32.totalorder %s677_s14, 3 }
   0xc   : > { %s880_s19 = scalar_select %p744_p4, 1, 0 }
   0xd   : > { %s881_s20 = scalar_select %p749_p6, 1, 0 }
   0xe   : > { %p754_p8 = pnand %p417_p5, %p113_p7  ;;  %s679_s22 = smov [#allocation6]  }
   0xf   : > { %s126_s23 = sshll.u32 %s679_s22, 4  ;;  %s31_s25 = sadd.s32 1, %s673_s13  ;;  %s127_s23 = int_to_ptr.vmem [resolvable:$true] %s126_s23 }
  0x10   : > { %p471_p10 = pneg %p754_p8  ;;  %s40_s26 = sadd.s32 1, %s665_s11 }
  0x11   : > { %p33_p12 = scmp.ge.s32.totalorder %s31_s25, 2  ;;  %s550_s27 = scalar_lea.vmem %s127_s23, 64 }
  0x12   : > { %p763_p11 = pnand %p471_p10, %p734_p1  ;;  %p551_p0 = scmp.ne.s32.totalorder %s127_s23, %s550_s27 }
  0x13   : > { %p558_p7 = scmp.lt.s32.totalorder %s127_s23, %s127_s23  ;;  %p559_p6 = scmp.lt.s32.totalorder %s550_s27, %s550_s27 }
  0x14   : > { %p541_p13 = pneg %p763_p11 }
  0x15   : > { %p560_p9 = por %p559_p6, %p558_p7 }
  0x16   : > { %p553_p3 = pnand %p551_p0, %p541_p13 }
  0x18   : > { %p554_p5 = pneg %p553_p3 }
  0x1a   : > { %p561_p4 = pnand %p560_p9, %p554_p5 }
  0x1c   : > { %564 = shalt.err (!%p561_p4)
}
  0x1d   : > { %474 = dma.hbm_to_vmem [thread:$0]  (!%p763_p11), %s875_s1, 64, %s127_s23, [#allocation7]  }
  0x1e   : > { %s895_s25 = smov (%p33_p12, %s31_s25), 0  ;;  %p47_p6 = scmp.ne.s32.totalorder %s665_s11, %s661_s10 }
  0x1f   : > { %p48_p4 = scmp.eq.s32.totalorder %s677_s14, 0  ;;  %s35_s30 = ssub.s32 %s673_s13, %s895_s25 }
  0x20   : > { %p484_p9 = scmp.lt.s32.totalorder %s677_s14, 2  ;;  %p38_p10 = scmp.eq.s32.totalorder %s35_s30, 0 }
  0x21   : > { %p49_p13 = por %p48_p4, %p47_p6  ;;  %p786_p0 = por %p738_p2, %p47_p6 }
  0x22   : > { %s137_s4 = sand.u32 1, %s665_s11   ;;  %s420_s6 = sshll.u32 %s673_s13, 4 }
  0x23   : > { %s792_s5 = scalar_select %p38_p10, %s665_s11, %s40_s26  }
  0x24   : > { %s140_s7 = scalar_lea.vmem [#allocation3], %s137_s4  ;;  %s146_s22 = scalar_lea.hbm %s874_s0, %s420_s6 }
  0x25   : > { %s148_s8 = sshll.u32 %s140_s7, 4  ;;  %p798_p11 = pnand %p484_p9, %p49_p13  ;;  %s149_s8 = int_to_ptr.vmem [resolvable:$true] %s148_s8 }
  0x26   : > { %s138_s18 = scalar_lea.sflag [#allocation4], %s137_s4  ;;  %s578_s24 = scalar_lea.vmem %s149_s8, 16 }
  0x27   : > { %p567_p2 = pneg %p798_p11  ;;  %p579_p12 = scmp.ne.s32.totalorder %s149_s8, %s578_s24 }
  0x28   : > { %s680_s26 = smov [#allocation3]  }
  0x29   : > { %p581_p3 = pnand %p579_p12, %p567_p2  ;;  %s583_s27 = sshll.u32 %s680_s26, 4  ;;  %s584_s27 = int_to_ptr.vmem [resolvable:$false] %s583_s27 }
  0x2a   : > { %s585_s28 = scalar_lea.vmem %s584_s27, 32  ;;  %p586_p7 = scmp.lt.s32.totalorder %s149_s8, %s584_s27 }
  0x2b   : > { %p582_p5 = pneg %p581_p3  ;;  %p587_p6 = scmp.lt.s32.totalorder %s585_s28, %s578_s24 }
  0x2d   : > { %p588_p4 = por %p587_p6, %p586_p7 }
  0x2f   : > { %p589_p10 = pnand %p588_p4, %p582_p5 }
  0x31   : > { %592 = shalt.err (!%p589_p10)
}
  0x32   : > { %478 = dma.hbm_to_vmem [thread:$0]  (!%p798_p11), %s146_s22, 16, %s149_s8, %s138_s18  }
  0x33   : > { %157 = sbr.rel (%p754_p8) target bundleno = 286 (0x11e), region = 28  ;;  %s809_s29 = sand.u32 (!%p754_p8), 1, %s661_s10  }
  0x34   : > { %s160_s30 = scalar_lea.sflag (!%p754_p8), [#allocation4], %s809_s29  ;;  %s162_s4 = scalar_lea.vmem (!%p754_p8), [#allocation3], %s809_s29 }
  0x35   : > { %p886_p9 = scmp.ne.s32.totalorder (!%p754_p8), %s880_s19, 0 }
  0x38   : > { %644 = dma.done.wait (%p886_p9), %s160_s30, 16  }
  0x39   : > { %646 = vsyncadd (%p886_p9), %s160_s30, 4294967280 }
  0x3a   : > { %648 = dma.done.wait (%p734_p1), [#allocation7], 64  }
  0x3b   : > { %650 = vsyncadd (%p734_p1), [#allocation7], 4294967232  ;;  %v187_v0 = vlaneseq  ;;  %v681_v1 = vmov 0.0   ;;  %vm682_vm0 = vmmov 0   ;;  %v186_v3 = vld [vmem:[%s162_s4] sm:$0x1] }
  0x3c   : > { %448 = vmatprep.subr.mxu0 %v681_v1  ;;  %460 = vmatprep.mubr.msk.f32.mxu0 %vm682_vm0, %v681_v1  ;;  %v217_v5 = vshra.s32 %v186_v3, 16  ;;  %v203_v6 = vshra.s32 %v186_v3, 8  ;;  %v190_v12 = vand.u32 255, %v186_v3  ;;  %v683_v13 = vmov 1.0   ;;  %v231_v15 = vld [vmem:[#allocation6] sm:$0xf] }
  0x3d   : > { %v188_v2 = vshrl.u32 %v187_v0, 7  ;;  %vm238_vm7 = vcmask 392192   ;;  %s423_s17 = sshll.u32 %s809_s29, 2  ;;  %s432_s6 = sshll.u32 %s669_s12, 6 }
  0x3e   : > { %v218_v8 = vand.u32 255, %v217_v5  ;;  %v204_v9 = vand.u32 255, %v203_v6  ;;  %s185_s19 = scalar_lea.vmem [#allocation8], %s423_s17  ;;  %s828_s15 = scalar_lea.hbm %s876_s2, %s432_s6 }
  0x3f   : > { %v193_v4 = vsub.s32 0, %v188_v2  ;;  %v189_v7 = vadd.s32 8, %v188_v2  ;;  %s328_s21 = sshll.u32 %s185_s19, 4  ;;  %s314_s16 = scalar_lea.sflag [#allocation5], %s809_s29  ;;  %s823_s21 = int_to_ptr.vmem [resolvable:$true] %s328_s21 }
  0x40   : > { %s593_s22 = scalar_lea.vmem %s823_s21, 64  ;;  %s684_s12 = smov [#allocation8]  }
  0x41   : > { %v222_v10 = vrot.slane %v218_v8, %v193_v4  ;;  %v208_v11 = vrot.slane %v204_v9, %v193_v4  ;;  %v194_v14 = vrot.slane %v190_v12, %v193_v4  ;;  %p594_p1 = scmp.ne.s32.totalorder %s823_s21, %s593_s22  ;;  %s597_s23 = sshll.u32 %s684_s12, 4  ;;  %s598_s23 = int_to_ptr.vmem [resolvable:$false] %s597_s23 }
  0x42   : > { %s599_s18 = scalar_lea.vmem %s598_s23, 128  ;;  %p600_p11 = scmp.lt.s32.totalorder %s823_s21, %s598_s23 }
  0x43   : > { %vm224_vm1 = vcmp.eq.s32.totalorder %v222_v10, %v189_v7  ;;  %vm223_vm2 = vcmp.eq.s32.totalorder %v222_v10, %v188_v2  ;;  %vm210_vm3 = vcmp.eq.s32.totalorder %v208_v11, %v189_v7  ;;  %vm209_vm4 = vcmp.eq.s32.totalorder %v208_v11, %v188_v2  ;;  %p595_p8 = pnand %p594_p1, %p786_p0  ;;  %p601_p2 = scmp.lt.s32.totalorder %s599_s18, %s593_s22 }
  0x44   : > { %449 = vmatpush3.msk.msra.mxu0 %vm224_vm1, %v683_v13  ;;  %vm196_vm5 = vcmp.eq.s32.totalorder %v194_v14, %v189_v7  ;;  %vm195_vm6 = vcmp.eq.s32.totalorder %v194_v14, %v188_v2 }
  0x45   : > { %450 = vmatprep.subr.mxu0 %v681_v1  ;;  %p596_p13 = pneg %p595_p8  ;;  %p602_p12 = por %p601_p2, %p600_p11 }
  0x46   : > { %451 = vmatpush3.msk.msra.mxu0 %vm223_vm2, %v683_v13 }
  0x47   : > { %452 = vmatprep.subr.mxu0 %v681_v1  ;;  %p603_p3 = pnand %p602_p12, %p596_p13 }
  0x48   : > { %453 = vmatpush3.msk.msra.mxu0 %vm210_vm3, %v683_v13 }
  0x49   : > { %454 = vmatprep.subr.mxu0 %v681_v1 }
  0x4a   : > { %455 = vmatpush3.msk.msra.mxu0 %vm209_vm4, %v683_v13 }
  0x4b   : > { %456 = vmatprep.subr.mxu0 %v681_v1 }
  0x4c   : > { %457 = vmatpush3.msk.msra.mxu0 %vm196_vm5, %v683_v13 }
  0x4d   : > { %458 = vmatprep.subr.mxu0 %v681_v1 }
  0x4e   : > { %459 = vmatpush3.msk.msra.mxu0 %vm195_vm6, %v683_v13 }
  0x4f   : > { %461 = vmatmul.mubr.msk.f32.vlgmr.msra.gmra.mxu0 %vm238_vm7, %v231_v15 }
 0x10f   : > { %v308_v16 = vpop.f32.mrf.mxu0 }
 0x110   : > { %312 = vst [vmem:[%s185_s19] sm:$0xf] %v308_v16 }
 0x111   : > { %v462_v17 = vpop.f32.mrf.mxu0 }
 0x112   : > { %606 = shalt.err (!%p603_p3)
}
 0x113   : > { %s607_s24 = scalar_lea.hbm %s828_s15, 64  ;;  %s611_s28 = scalar_lea.hbm %s876_s2, 128 }
 0x114   : > { %p608_p5 = scmp.ne.s32.totalorder %s828_s15, %s607_s24  ;;  %p612_p4 = scmp.lt.s32.totalorder %s828_s15, %s876_s2 }
 0x115   : > { %p613_p10 = scmp.lt.s32.totalorder %s611_s28, %s607_s24 }
 0x116   : > { %p609_p7 = pnand %p608_p5, %p786_p0 }
 0x117   : > { %p614_p9 = por %p613_p10, %p612_p4 }
 0x118   : > { %p610_p6 = pneg %p609_p7 }
 0x11a   : > { %p615_p1 = pnand %p614_p9, %p610_p6 }
 0x11c   : > { %618 = shalt.err (!%p615_p1)
}
 0x11d   : > { %469 = dma.vmem_to_hbm [thread:$0]  (%p786_p0), %s823_s21, 64, %s828_s15, %s314_s16  }
 0x11e PF: > { %s340_s4 = sand.u32 1, %s657_s9   ;;  %p887_p8 = scmp.ne.s32.totalorder %s881_s20, 0 }
 0x11f   : > { %p888_p13 = scmp.ge.s32.totalorder %s677_s14, 2  ;;  %s341_s17 = scalar_lea.sflag [#allocation5], %s340_s4 }
 0x121   : > { %p480_p11 = pnand %p888_p13, %p887_p8 }
 0x123   : > { %p481_p2 = pneg %p480_p11 }
 0x125   : > { %652 = dma.done.wait (%p481_p2), %s341_s17, 64  }
 0x126   : > { %654 = vsyncadd (%p481_p2), %s341_s17, 4294967232  ;;  %s19_s14 = sadd.s32 1, %s677_s14   ;;  %s889_s9 = smov %s661_s10 }
 0x127   : > { %p16_p12 = scmp.ge.s32.totalorder %s19_s14, 4   ;;  %s890_s10 = smov %s665_s11 }
 0x128   : > { %s891_s11 = smov %s792_s5  ;;  %s892_s12 = smov %s673_s13 }
 0x129   : > { %s893_s13 = smov %s895_s25  ;;  %18 = sbr.rel (!%p16_p12) target bundleno = 7 (0x7), region = 77 }
 0x12e   :  { %346 = vsyncpa [#allocation4], 1 }
 0x12f   :  { %348 = vsyncpa [#allocation4 + $0x1], 1 }
 0x130   :  { %349 = vsyncpa [#allocation7], 1 }
 0x131   :  { %350 = vsyncpa [#allocation5], 1 }
 0x132   :  { %352 = vsyncpa [#allocation5 + $0x1], 1 }

</bundles_post_ra>
